<compile_context>
chip_gen: v6e
topology: v6e:2x2x1
jax: 0.10.0
libtpu: 0.0.40
codegen_flags: <defaults>
</compile_context>

<pallas_src>
import functools

import numpy as np
import jax
import jax.numpy as jnp
from jax.experimental import pallas as pl
from jax.experimental.pallas import tpu as pltpu


def auxnet_kernel(x_ref, batch_ref, wslab_ref, bias_ref, y_ref, out_ref, *,
                  F, E, H, S, G, block_starts):
    N = x_ref.shape[0]

    # ---- unpack packed parameters with static, lane-0-aligned windows ----
    w_emb = wslab_ref[0:F, :E]                      # [F, E]  bf16
    w1 = wslab_ref[F:F + E, :H]                     # [E, H]  bf16
    w2 = wslab_ref[F + E:F + E + H, :S]             # [H, S]  bf16

    b_emb = bias_ref[0:1, :E]                       # [1, E]  f32
    b1 = bias_ref[1:2, :H]                          # [1, H]  f32
    b2 = bias_ref[2:3, :S]                          # [1, S]  f32

    # ---- sum-pool one-hot built in-kernel from batch ids (VPU iota) ----
    gid = jax.lax.broadcasted_iota(jnp.int32, (G, N), 0)
    pool_f = jnp.where(batch_ref[...] == gid, 1.0, 0.0)          # [G, N] f32
    pool_bf = pool_f.astype(jnp.bfloat16)
    n_nodes = jnp.sum(pool_f, axis=1, keepdims=True)              # [G, 1]

    # ---- molecule_model stub folded through global_add_pool ----
    #   pool @ (x @ W_emb + b_emb) == (pool @ x) @ W_emb + rowsum(pool) * b_emb
    px = jnp.dot(pool_bf, x_ref[...],
                 preferred_element_type=jnp.float32)               # [G, F] f32
    g = (jnp.dot(px.astype(jnp.bfloat16), w_emb,
                 preferred_element_type=jnp.float32)
         + n_nodes * b_emb)                                        # [G, E] f32

    # ---- aux_classifier: Linear -> ReLU -> Linear (bf16 ops, f32 accum) ----
    h = jnp.maximum(jnp.dot(g.astype(jnp.bfloat16), w1,
                            preferred_element_type=jnp.float32) + b1, 0.0)
    logits = (jnp.dot(h.astype(jnp.bfloat16), w2,
                      preferred_element_type=jnp.float32) + b2)    # [G, S] f32

    # ---- mask = index[y] built in-kernel (lane-iota psi-block ids) ----
    s_iota = jax.lax.broadcasted_iota(jnp.int32, (1, 1, S), 2)
    block_id = jnp.zeros((1, 1, S), jnp.int32)
    for c in block_starts[1:]:                       # static unrolled, K-1 adds
        block_id = block_id + (s_iota >= c).astype(jnp.int32)
    mask = jnp.where(y_ref[...] == block_id, 1.0, 1e-08)          # [G, K, S]

    # ---- mask_softmax(output, mask, dim=1), PyTorch broadcasting semantics --
    # f32 epilogue; num[g,k,s] = e[k,s] * mask[g,k,s] (requires G == len(psi)).
    z = jnp.max(logits, axis=1, keepdims=True)       # torch: x.max(dim=1)[0]
    e = jnp.exp(logits - z)                          # [G, S]
    num = e[None, :, :] * mask                       # [G, K, S]
    denom = jnp.sum(num, axis=1, keepdims=True) + 1e-07            # [G, 1, S]
    out_ref[...] = num * pl.reciprocal(denom, approx=True)


def auxiliary_net_forward(x_feat, batch, y, w_emb, b_emb, w1, b1, w2, b2, *,
                          psi, num_graphs):
    N, F = x_feat.shape
    E = w_emb.shape[1]
    H = w1.shape[1]
    S = w2.shape[1]
    K = len(psi)
    G = int(num_graphs)
    W = max(E, H, S)
    block_starts = tuple(int(np.sum(psi[:i])) for i in range(K))

    # bf16 matmul operands (kernel accumulates in f32).
    x_bf = x_feat.astype(jnp.bfloat16)
    batch_row = batch.reshape(1, N).astype(jnp.int32)       # [1, N]
    y3 = y.reshape(G, K, 1).astype(jnp.int32)               # [G, K, 1]

    # Pack the three weight matrices into ONE bf16 slab (one DMA, not three).
    wslab = jnp.zeros((F + E + H, W), dtype=jnp.bfloat16)
    wslab = wslab.at[0:F, :E].set(w_emb.astype(jnp.bfloat16))
    wslab = wslab.at[F:F + E, :H].set(w1.astype(jnp.bfloat16))
    wslab = wslab.at[F + E:, :S].set(w2.astype(jnp.bfloat16))

    # Pack the three bias vectors into ONE f32 array (one DMA, not three).
    bias_pack = jnp.zeros((3, W), dtype=jnp.float32)
    bias_pack = bias_pack.at[0, :E].set(b_emb.reshape(-1).astype(jnp.float32))
    bias_pack = bias_pack.at[1, :H].set(b1.reshape(-1).astype(jnp.float32))
    bias_pack = bias_pack.at[2, :S].set(b2.reshape(-1).astype(jnp.float32))

    vmem = pl.BlockSpec(memory_space=pltpu.MemorySpace.VMEM)
    kernel = functools.partial(auxnet_kernel, F=F, E=E, H=H, S=S, G=G,
                               block_starts=block_starts)
    return pl.pallas_call(
        kernel,
        out_shape=jax.ShapeDtypeStruct((G, K, S), jnp.float32),
        in_specs=[vmem] * 5,
        out_specs=vmem,
    )(x_bf, batch_row, wslab, bias_pack, y3)


def reference_forward(x_feat, w_emb, b_emb, pool_onehot, w1, b1, w2, b2, mask):
    # Pure f32 reference, structured exactly like the PyTorch module
    # (node embedding -> pool -> classifier -> mask_softmax).
    node = x_feat @ w_emb + b_emb
    g = pool_onehot @ node
    h = jnp.maximum(g @ w1 + b1, 0.0)
    out = h @ w2 + b2
    z = out.max(axis=1, keepdims=True)
    e = jnp.exp(out - z)
    num = e[None, :, :] * mask
    den = num.sum(axis=1, keepdims=True)
    return num / (den + 1e-07)


if __name__ == "__main__":
    # ----- small deterministic configuration -----
    psi = [3, 5, 4, 4]               # len(psi) = 4, sum(psi) = 16
    K = len(psi)
    S = int(np.sum(psi))
    G = K                            # G must equal len(psi) for the PyTorch broadcast
    N = 24                           # total nodes in the batch
    F = 16                           # raw node-feature dim (molecule_model stub input)
    E = 32                           # args.emb_dim
    H = 128                          # hidden width of aux_classifier

    key = jax.random.PRNGKey(0)
    ks = jax.random.split(key, 8)

    # inputs (graph batch)
    x_feat = jax.random.normal(ks[0], (N, F), dtype=jnp.float32)
    batch = jnp.repeat(jnp.arange(G, dtype=jnp.int32), N // G)          # node -> graph id
    data_y = (jax.random.bernoulli(ks[1], 0.5, (G, K)).astype(jnp.int32) * 2 - 1)  # {-1,+1}

    # parameters (deterministic init)
    w_emb = jax.random.normal(ks[2], (F, E), dtype=jnp.float32) * 0.1
    b_emb = jnp.zeros((1, E), dtype=jnp.float32)
    w1 = jax.random.normal(ks[3], (E, H), dtype=jnp.float32) * 0.1
    b1 = jax.random.normal(ks[4], (1, H), dtype=jnp.float32) * 0.01
    w2 = jax.random.normal(ks[5], (H, S), dtype=jnp.float32) * 0.1
    b2 = jax.random.normal(ks[6], (1, S), dtype=jnp.float32) * 0.01

    # labels: {-1,1} -> {0,1}, exactly as in forward()
    y = ((data_y.reshape(-1, K) + 1) // 2).astype(jnp.int32)            # [G, K]

    # ----- fused Pallas kernel -----
    fwd = jax.jit(functools.partial(auxiliary_net_forward, psi=psi, num_graphs=G))
    label_pred = fwd(x_feat, batch, y, w_emb, b_emb, w1, b1, w2, b2)
    label_pred = jax.block_until_ready(label_pred)

    # ----- pure-f32 reference (builds pool one-hot and index[y] explicitly) --
    pool_onehot = (batch[None, :] == jnp.arange(G)[:, None]).astype(jnp.float32)  # [G, N]
    index_np = np.zeros((K, S), dtype=np.float32) + 1e-08
    for i in range(K):
        index_np[i, int(np.sum(psi[:i])):int(np.sum(psi[:i + 1]))] = 1.0
    mask = jnp.take(jnp.asarray(index_np), y, axis=0)                   # [G, K, S]
    ref = reference_forward(
        x_feat, w_emb, b_emb, pool_onehot, w1, b1, w2, b2, mask)

    assert label_pred.shape == (G, K, S)
    assert bool(jnp.all(jnp.isfinite(label_pred)))
    # Loose tolerance: kernel uses bf16 matmul operands (f32 accumulation) and
    # an approximate EUP reciprocal, compared against a pure-f32 reference.
    assert jnp.allclose(label_pred, ref, rtol=5e-2, atol=5e-2), "mismatch vs reference"

    print("KERNEL_OK")
</pallas_src>

<mosaic_0001>
module attributes {stable_mosaic.version = 11 : i64} {
  func.func @auxnet_kernel(%arg0: memref<24x16xbf16, #tpu.memory_space<vmem>>, %arg1: memref<1x24xi32, #tpu.memory_space<vmem>>, %arg2: memref<176x128xbf16, #tpu.memory_space<vmem>>, %arg3: memref<3x128xf32, #tpu.memory_space<vmem>>, %arg4: memref<4x4x1xi32, #tpu.memory_space<vmem>>, %arg5: memref<4x4x16xf32, #tpu.memory_space<vmem>>) attributes {dimension_semantics = [], scalar_prefetch = 0 : i64, scratch_operands = 0 : i64, tpu.core_type = #tpu.core_type<tc>} {
    %c0 = arith.constant 0 : index
    %c0_0 = arith.constant 0 : index
    %0 = vector.load %arg2[%c0, %c0_0] : memref<176x128xbf16, #tpu.memory_space<vmem>>, vector<16x32xbf16>
    %c16 = arith.constant 16 : index
    %c0_1 = arith.constant 0 : index
    %1 = vector.load %arg2[%c16, %c0_1] : memref<176x128xbf16, #tpu.memory_space<vmem>>, vector<32x128xbf16>
    %c48 = arith.constant 48 : index
    %c0_2 = arith.constant 0 : index
    %2 = vector.load %arg2[%c48, %c0_2] : memref<176x128xbf16, #tpu.memory_space<vmem>>, vector<128x16xbf16>
    %c0_3 = arith.constant 0 : index
    %c0_4 = arith.constant 0 : index
    %3 = vector.load %arg3[%c0_3, %c0_4] : memref<3x128xf32, #tpu.memory_space<vmem>>, vector<1x32xf32>
    %c1 = arith.constant 1 : index
    %c0_5 = arith.constant 0 : index
    %4 = vector.load %arg3[%c1, %c0_5] : memref<3x128xf32, #tpu.memory_space<vmem>>, vector<1x128xf32>
    %c2 = arith.constant 2 : index
    %c0_6 = arith.constant 0 : index
    %5 = vector.load %arg3[%c2, %c0_6] : memref<3x128xf32, #tpu.memory_space<vmem>>, vector<1x16xf32>
    %6 = tpu.iota {dimensions = array<i32: 0>} : vector<4x24xi32>
    %c0_7 = arith.constant 0 : index
    %c0_8 = arith.constant 0 : index
    %7 = vector.load %arg1[%c0_7, %c0_8] : memref<1x24xi32, #tpu.memory_space<vmem>>, vector<1x24xi32>
    %8 = vector.broadcast %7 : vector<1x24xi32> to vector<4x24xi32>
    %9 = arith.cmpi eq, %8, %6 : vector<4x24xi32>
    %cst = arith.constant 1.000000e+00 : f32
    %cst_9 = arith.constant 0.000000e+00 : f32
    %10 = vector.broadcast %cst : f32 to vector<4x24xf32>
    %11 = vector.broadcast %cst_9 : f32 to vector<4x24xf32>
    %12 = arith.select %9, %10, %11 : vector<4x24xi1>, vector<4x24xf32>
    %13 = arith.truncf %12 : vector<4x24xf32> to vector<4x24xbf16>
    %cst_10 = arith.constant dense<0.000000e+00> : vector<4xf32>
    %14 = vector.multi_reduction <add>, %12, %cst_10 [1] : vector<4x24xf32> to vector<4xf32>
    %15 = vector.shape_cast %14 : vector<4xf32> to vector<4x1xf32>
    %c0_11 = arith.constant 0 : index
    %c0_12 = arith.constant 0 : index
    %16 = vector.load %arg0[%c0_11, %c0_12] : memref<24x16xbf16, #tpu.memory_space<vmem>>, vector<24x16xbf16>
    %cst_13 = arith.constant dense<0.000000e+00> : vector<4x16xf32>
    %17 = tpu.matmul %13, %16, %cst_13 {dimension_numbers = #tpu.dot_dimension_numbers<[1], [0], [0], [1], [0, 0, 1, 1], [], []>} : vector<4x24xbf16>, vector<24x16xbf16>, vector<4x16xf32> -> vector<4x16xf32>
    %18 = arith.truncf %17 : vector<4x16xf32> to vector<4x16xbf16>
    %cst_14 = arith.constant dense<0.000000e+00> : vector<4x32xf32>
    %19 = tpu.matmul %18, %0, %cst_14 {dimension_numbers = #tpu.dot_dimension_numbers<[1], [0], [0], [1], [0, 0, 1, 1], [], []>} : vector<4x16xbf16>, vector<16x32xbf16>, vector<4x32xf32> -> vector<4x32xf32>
    %20 = vector.broadcast %15 : vector<4x1xf32> to vector<4x32xf32>
    %21 = vector.broadcast %3 : vector<1x32xf32> to vector<4x32xf32>
    %22 = arith.mulf %20, %21 : vector<4x32xf32>
    %23 = arith.addf %19, %22 : vector<4x32xf32>
    %24 = arith.truncf %23 : vector<4x32xf32> to vector<4x32xbf16>
    %cst_15 = arith.constant dense<0.000000e+00> : vector<4x128xf32>
    %25 = tpu.matmul %24, %1, %cst_15 {dimension_numbers = #tpu.dot_dimension_numbers<[1], [0], [0], [1], [0, 0, 1, 1], [], []>} : vector<4x32xbf16>, vector<32x128xbf16>, vector<4x128xf32> -> vector<4x128xf32>
    %26 = vector.broadcast %4 : vector<1x128xf32> to vector<4x128xf32>
    %27 = arith.addf %25, %26 : vector<4x128xf32>
    %cst_16 = arith.constant 0.000000e+00 : f32
    %28 = vector.broadcast %cst_16 : f32 to vector<4x128xf32>
    %29 = arith.maximumf %27, %28 : vector<4x128xf32>
    %30 = arith.truncf %29 : vector<4x128xf32> to vector<4x128xbf16>
    %cst_17 = arith.constant dense<0.000000e+00> : vector<4x16xf32>
    %31 = tpu.matmul %30, %2, %cst_17 {dimension_numbers = #tpu.dot_dimension_numbers<[1], [0], [0], [1], [0, 0, 1, 1], [], []>} : vector<4x128xbf16>, vector<128x16xbf16>, vector<4x16xf32> -> vector<4x16xf32>
    %32 = vector.broadcast %5 : vector<1x16xf32> to vector<4x16xf32>
    %33 = arith.addf %31, %32 : vector<4x16xf32>
    %34 = tpu.iota {dimensions = array<i32: 2>} : vector<1x1x16xi32>
    %c0_i32 = arith.constant 0 : i32
    %35 = vector.broadcast %c0_i32 : i32 to vector<1x1x16xi32>
    %c3_i32 = arith.constant 3 : i32
    %36 = vector.broadcast %c3_i32 : i32 to vector<1x1x16xi32>
    %37 = arith.cmpi sge, %34, %36 : vector<1x1x16xi32>
    %38 = arith.extui %37 : vector<1x1x16xi1> to vector<1x1x16xi32>
    %39 = arith.addi %35, %38 : vector<1x1x16xi32>
    %c8_i32 = arith.constant 8 : i32
    %40 = vector.broadcast %c8_i32 : i32 to vector<1x1x16xi32>
    %41 = arith.cmpi sge, %34, %40 : vector<1x1x16xi32>
    %42 = arith.extui %41 : vector<1x1x16xi1> to vector<1x1x16xi32>
    %43 = arith.addi %39, %42 : vector<1x1x16xi32>
    %c12_i32 = arith.constant 12 : i32
    %44 = vector.broadcast %c12_i32 : i32 to vector<1x1x16xi32>
    %45 = arith.cmpi sge, %34, %44 : vector<1x1x16xi32>
    %46 = arith.extui %45 : vector<1x1x16xi1> to vector<1x1x16xi32>
    %47 = arith.addi %43, %46 : vector<1x1x16xi32>
    %c0_18 = arith.constant 0 : index
    %c0_19 = arith.constant 0 : index
    %c0_20 = arith.constant 0 : index
    %48 = vector.load %arg4[%c0_18, %c0_19, %c0_20] : memref<4x4x1xi32, #tpu.memory_space<vmem>>, vector<4x4x1xi32>
    %49 = vector.broadcast %48 : vector<4x4x1xi32> to vector<4x4x16xi32>
    %50 = vector.broadcast %47 : vector<1x1x16xi32> to vector<4x4x16xi32>
    %51 = arith.cmpi eq, %49, %50 : vector<4x4x16xi32>
    %cst_21 = arith.constant 1.000000e+00 : f32
    %cst_22 = arith.constant 9.99999993E-9 : f32
    %52 = vector.broadcast %cst_21 : f32 to vector<4x4x16xf32>
    %53 = vector.broadcast %cst_22 : f32 to vector<4x4x16xf32>
    %54 = arith.select %51, %52, %53 : vector<4x4x16xi1>, vector<4x4x16xf32>
    %cst_23 = arith.constant dense<0xFF800000> : vector<4xf32>
    %55 = vector.multi_reduction <maximumf>, %33, %cst_23 [1] : vector<4x16xf32> to vector<4xf32>
    %56 = vector.shape_cast %55 : vector<4xf32> to vector<4x1xf32>
    %57 = vector.broadcast %56 : vector<4x1xf32> to vector<4x16xf32>
    %58 = arith.subf %33, %57 : vector<4x16xf32>
    %59 = math.exp %58 : vector<4x16xf32>
    %60 = vector.shape_cast %59 : vector<4x16xf32> to vector<1x4x16xf32>
    %61 = vector.broadcast %60 : vector<1x4x16xf32> to vector<4x4x16xf32>
    %62 = arith.mulf %61, %54 : vector<4x4x16xf32>
    %cst_24 = arith.constant dense<0.000000e+00> : vector<4x16xf32>
    %63 = vector.multi_reduction <add>, %62, %cst_24 [1] : vector<4x4x16xf32> to vector<4x16xf32>
    %64 = vector.shape_cast %63 : vector<4x16xf32> to vector<4x1x16xf32>
    %cst_25 = arith.constant 1.000000e-07 : f32
    %65 = vector.broadcast %cst_25 : f32 to vector<4x1x16xf32>
    %66 = arith.addf %64, %65 : vector<4x1x16xf32>
    %67 = tpu.reciprocal %66 {approx = true} : vector<4x1x16xf32> -> vector<4x1x16xf32>
    %68 = vector.broadcast %67 : vector<4x1x16xf32> to vector<4x4x16xf32>
    %69 = arith.mulf %62, %68 : vector<4x4x16xf32>
    %c0_26 = arith.constant 0 : index
    %c0_27 = arith.constant 0 : index
    %c0_28 = arith.constant 0 : index
    %70 = vector.load %arg5[%c0_26, %c0_27, %c0_28] : memref<4x4x16xf32, #tpu.memory_space<vmem>>, vector<4x4x16xf32>
    tpu.vector_store %arg5[%c0_26, %c0_27, %c0_28], %69 {strides = array<i32>} : memref<4x4x16xf32, #tpu.memory_space<vmem>>, vector<4x4x16xf32>,
    return
  }
}

</mosaic_0001>

<bundles_post_ra>
// kernel: auxiliary_net_forward.1
= control target key start
LH: loop header
LB: loop body
LE: loop exit
PB: predicated region body
PF: predicated region fallthrough
CT: control target
= control target key end

     0   :  { %vm77_vm0 = vcmask 1043456   ;;  %v47_v1 = vlaneseq  ;;  %v570_v2 = vmov 0.0   ;;  %vm571_vm1 = vmmov 0   ;;  %s706_s0 = inlined_call_operand.vmem [shape: bf16[24,16], index: 0, kind: input, shape index: {}]   ;;  %s707_s1 = inlined_call_operand.vmem [shape: s32[1,24], index: 1, kind: input, shape index: {}]   ;;  %s708_s2 = inlined_call_operand.vmem [shape: bf16[176,128], index: 2, kind: input, shape index: {}]   ;;  %s709_s3 = inlined_call_operand.vmem [shape: f32[3,128], index: 3, kind: input, shape index: {}]   ;;  %s710_s4 = inlined_call_operand.vmem [shape: s32[4,4,1], index: 4, kind: input, shape index: {}]   ;;  %s711_s5 = inlined_call_operand.hbm [shape: f32[4,4,16], index: 5, kind: output, shape index: {}]  }
   0x1   :  { %v525_v0 = vld [vmem:[%s706_s0 + $0x8] ss:$0 sps:$4 sm:$0xff]   ;;  %474 = vmatprep.subr.bf16.mxu1 %v570_v2  ;;  %496 = vmatprep.subr.bf16.mxu0 %v570_v2  ;;  %v526_v4 = vld [vmem:[%s706_s0] sm:$0xff]   ;;  %vm73_vm2 = vcmask 195584  }
   0x2   :  { %v79_v3 = vsel %vm77_vm0, %v525_v0, 0  ;;  %478 = vmatprep.mubr.msk.bf16.mxu1 %vm571_vm1, %v570_v2  ;;  %v48_v5 = vshrl.u32 %v47_v1, 7  ;;  %v437_v6 = vld [vmem:[%s707_s1] ss:$0 sm:$0xff]  ;;  %512 = vmatprep.mubr.msk.bf16.mxu0 %vm571_vm1, %v570_v2 }
   0x3   :  { %475 = vmatpush3.bf16.msra.mxu1 %v79_v3  ;;  %v527_v8 = vld [vmem:[%s708_s2] sm:$0xff]  }
   0x4   :  { %476 = vmatprep.subr.bf16.mxu1 %v570_v2  ;;  %vm54_vm3 = vcmp.eq.s32.totalorder %v437_v6, %v48_v5 }
   0x5   :  { %v55_v7 = vsel %vm54_vm3, 1.0, %v570_v2 }
   0x6   :  { %v56_v9 = vpack.c.bf16 %v55_v7, %v55_v7 }
   0x7   :  { %477 = vmatpush3.bf16.msra.mxu1 %v526_v4 }
   0x8   :  { %482 = vmatprep.subr.bf16.mxu1 %v570_v2 }
   0xa   :  { %479 = vmatmul.mubr.msk.bf16.vlgmr.msra.gmra.mxu1 %vm73_vm2, %v56_v9 }
   0xb   :  { %10 = vsyncpa [#allocation3], 0  ;;  %483 = vmatpush3.bf16.msra.mxu1 %v527_v8  ;;  %484 = vmatprep.mubr.msk.bf16.mxu1 %vm571_vm1, %v570_v2  ;;  %vm57_vm4 = vcmask 191488   ;;  %vm133_vm5 = vcmask 130048   ;;  %v528_v12 = vld [vmem:[%s708_s2 + $0x10] sm:$0xff]   ;;  %v529_v17 = vld [vmem:[%s708_s2 + $0x8] sm:$0xff]  }
   0xc   :  { %488 = vmatprep.subr.bf16.mxu1 %v570_v2  ;;  %v58_v10 = vsel %vm57_vm4, %v55_v7, 0.0  ;;  %v530_v18 = vld [vmem:[%s708_s2 + $0x50] sm:$0xff]   ;;  %v531_v19 = vld [vmem:[%s708_s2 + $0x48] sm:$0xff]   ;;  %v532_v20 = vld [vmem:[%s708_s2 + $0x40] sm:$0xff]   ;;  %vm194_vm6 = vcmask 261120   ;;  %v572_v44 = vmov 0  }
   0xd   :  { %59 = vadd.xlane.f32.xlu0 %v58_v10  ;;  %497 = vmatpush3.bf16.msra.mxu0 %v530_v18  ;;  %v533_v21 = vld [vmem:[%s708_s2 + $0x38] sm:$0xff]   ;;  %v534_v22 = vld [vmem:[%s708_s2 + $0x30] sm:$0xff]   ;;  %v535_v23 = vld [vmem:[%s708_s2 + $0x28] sm:$0xff]   ;;  %vm366_vm7 = vcmask 125952   ;;  %v333_v55 = vand.u32 127, %v47_v1 }
   0xe   :  { %498 = vmatprep.subr.bf16.mxu0 %v570_v2  ;;  %v441_v25 = vld [vmem:[%s709_s3] ss:$0 sm:$0xff]  ;;  %v537_v34 = vld [vmem:[%s708_s2 + $0x18] sm:$0xff]   ;;  %v444_v35 = vld [vmem:[%s709_s3 + $0x1] ss:$0 sm:$0xff]  ;;  %523 = vset.pattern.permute.xlu1 %v572_v44 }
   0xf   :  { %v536_v33 = vld [vmem:[%s708_s2 + $0x20] sm:$0xff]   ;;  %524 = vset.pattern.permute.xlu0 %v572_v44  ;;  %v345_v46 = vld [vmem:[%s710_s4 + $0xc] sm:$0xf]  ;;  %v344_v54 = vld [vmem:[%s710_s4 + $0x8] sm:$0xf]  ;;  %vm334_vm8 = vcmp.ge.s32.totalorder %v333_v55, 3 }
  0x10   :  { %v342_v43 = vld [vmem:[%s710_s4] sm:$0xf]  ;;  %v343_v45 = vld [vmem:[%s710_s4 + $0x4] sm:$0xf]  ;;  %vm336_vm9 = vcmp.ge.s32.totalorder %v333_v55, 8  ;;  %v335_v60 = vsel %vm334_vm8, 1, %v572_v44 }
  0x11   :  { %499 = vmatpush3.bf16.msra.mxu0 %v531_v19  ;;  %347 = vperm.xlu1 %523, %v342_v43   ;;  %v448_v47 = vld [vmem:[%s709_s3 + $0x2] ss:$0 sm:$0xff]  ;;  %v337_v61 = vsel %vm336_vm9, 1, %v572_v44  ;;  %vm339_vm10 = vcmp.ge.s32.totalorder %v333_v55, 12  ;;  %v573_v1 = vmov 1e-08  }
  0x12   :  { %500 = vmatprep.subr.bf16.mxu0 %v570_v2  ;;  %v338_v63 = vadd.s32 %v337_v61, %v335_v60  ;;  %v340_v0 = vsel %vm339_vm10, 1, %v572_v44  ;;  %s574_s3 = smov [#allocation2]  }
  0x13   :  { %s426_s4 = sshll.u32 %s574_s3, 4  ;;  %s427_s4 = int_to_ptr.vmem [resolvable:$true] %s426_s4 }
  0x14   :  { %v341_v3 = vadd.s32 %v340_v0, %v338_v63  ;;  %s548_s30 = scalar_lea.vmem %s427_s4, 256  ;;  %p553_p1 = scmp.lt.s32.totalorder %s427_s4, %s427_s4 }
  0x15   :  { %501 = vmatpush3.bf16.msra.mxu0 %v532_v20  ;;  %350 = vperm.xlu1 %523, %v343_v45   ;;  %p549_p0 = scmp.ne.s32.totalorder %s427_s4, %s548_s30  ;;  %p554_p2 = scmp.lt.s32.totalorder %s548_s30, %s548_s30 }
  0x16   :  { %502 = vmatprep.subr.bf16.mxu0 %v570_v2 }
  0x17   :  { %p555_p3 = por %p554_p2, %p553_p1 }
  0x19   :  { %503 = vmatpush3.bf16.msra.mxu0 %v533_v21  ;;  %356 = vperm.xlu1 %523, %v345_v46   ;;  %p556_p4 = pnand %p555_p3, %p549_p0 }
  0x1a   :  { %504 = vmatprep.subr.bf16.mxu0 %v570_v2 }
  0x1d   :  { %505 = vmatpush3.bf16.msra.mxu0 %v534_v22 }
  0x1e   :  { %506 = vmatprep.subr.bf16.mxu0 %v570_v2 }
  0x21   :  { %507 = vmatpush3.bf16.msra.mxu0 %v535_v23 }
  0x22   :  { %508 = vmatprep.subr.bf16.mxu0 %v570_v2 }
  0x25   :  { %509 = vmatpush3.bf16.msra.mxu0 %v536_v33 }
  0x26   :  { %510 = vmatprep.subr.bf16.mxu0 %v570_v2 }
  0x29   :  { %511 = vmatpush3.bf16.msra.mxu0 %v537_v34 }
  0x8c   :  { %v348_v56 = vpop.permute.xlu1 %347 }
  0x8d   :  { %vm358_vm12 = vcmp.eq.s32.totalorder %v348_v56, %v341_v3 }
  0x8e   :  { %v362_v7 = vsel %vm358_vm12, 1.0, %v573_v1 }
  0x90   :  { %v351_v62 = vpop.permute.xlu1 %350 }
  0x91   :  { %vm359_vm13 = vcmp.eq.s32.totalorder %v351_v62, %v341_v3 }
  0x92   :  { %v363_v8 = vsel %vm359_vm13, 1.0, %v573_v1 }
  0x94   :  { %v357_v4 = vpop.permute.xlu1 %356 }
  0x95   :  { %vm361_vm14 = vcmp.eq.s32.totalorder %v357_v4, %v341_v3 }
  0x96   :  { %v60_v24 = vpop.xlane.xlu0 %59  ;;  %v365_v9 = vsel %vm361_vm14, 1.0, %v573_v1 }
  0x97   :  { %v126_v26 = vmul.f32 %v441_v25, %v60_v24 }
  0xca   :  { %v115_v11 = vpop.f32.mrf.mxu1 }
  0xcb   :  { %v121_v13 = vpack.c.bf16 %v115_v11, %v115_v11 }
  0xcc   :  { %v480_v14 = vpop.f32.mrf.mxu1 }
  0xcd   :  { %485 = vmatmul.mubr.msk.bf16.vlgmr.msra.gmra.mxu1 %vm133_vm5, %v121_v13 }
  0xce   :  { %v118_v15 = vpop.f32.mrf.mxu1  ;;  %489 = vmatpush3.bf16.msra.mxu1 %v528_v12  ;;  %492 = vmatprep.mubr.msk.bf16.mxu1 %vm571_vm1, %v570_v2 }
  0xcf   :  { %490 = vmatprep.subr.bf16.mxu1 %v570_v2 }
  0xd0   :  { %v481_v16 = vpop.f32.mrf.mxu1 }
  0xd2   :  { %491 = vmatpush3.bf16.msra.mxu1 %v529_v17 }
 0x18d   :  { %v171_v27 = vpop.f32.mrf.mxu1 }
 0x18e   :  { %v172_v28 = vadd.f32 %v171_v27, %v126_v26 }
 0x18f   :  { %v486_v29 = vpop.f32.mrf.mxu1 }
 0x190   :  { %v177_v30 = vpack.c.bf16 %v172_v28, %v172_v28 }
 0x191   :  { %v174_v31 = vpop.f32.mrf.mxu1 }
 0x192   :  { %493 = vmatmul.mubr.msk.bf16.vlgmr.msra.gmra.mxu1 %vm194_vm6, %v177_v30 }
 0x193   :  { %v487_v32 = vpop.f32.mrf.mxu1 }
 0x252   :  { %v232_v36 = vpop.f32.mrf.mxu1 }
 0x253   :  { %v233_v37 = vadd.f32 %v444_v35, %v232_v36 }
 0x254   :  { %v494_v38 = vpop.f32.mrf.mxu1 }
 0x255   :  { %v238_v39 = vmax.f32 %v233_v37, 0.0 }
 0x256   :  { %v235_v40 = vpop.f32.mrf.mxu1 }
 0x257   :  { %v239_v41 = vpack.c.bf16 %v238_v39, %v238_v39 }
 0x258   :  { %v495_v42 = vpop.f32.mrf.mxu1 }
 0x259   :  { %513 = vmatmul.mubr.bf16.vlgmr.msra.gmra.mxu0 %v239_v41 }
 0x319   :  { %v326_v48 = vpop.f32.mrf.mxu0 }
 0x31a   :  { %v327_v49 = vadd.f32 %v448_v47, %v326_v48 }
 0x31b   :  { %v514_v50 = vpop.f32.mrf.mxu0 }
 0x31c   :  { %v367_v51 = vsel %vm366_vm7, %v327_v49, -inf }
 0x31d   :  { %368 = vmax.xlane.f32.xlu0 %v367_v51  ;;  %v329_v52 = vpop.f32.mrf.mxu0 }
 0x31f   :  { %v515_v53 = vpop.f32.mrf.mxu0 }
 0x333   :  { %353 = vperm.xlu0 %524, %v344_v54  }
 0x3a6   :  { %v369_v57 = vpop.xlane.xlu0 %368 }
 0x3a7   :  { %v370_v58 = vsub.f32 %v327_v49, %v369_v57 }
 0x3a9   :  { %v371_v59 = vmul.f32 1.442695, %v370_v58 }
 0x3ab   :  { %538 = vpow2.f32 %v371_v59 }
 0x3ae   :  { %v354_v2 = vpop.permute.xlu0 %353 }
 0x3af   :  { %vm360_vm11 = vcmp.eq.s32.totalorder %v354_v2, %v341_v3 }
 0x3b0   :  { %v364_v5 = vsel %vm360_vm11, 1.0, %v573_v1 }
 0x3b8   :  { %v539_v6 = vpop.eup %538 }
 0x3b9   :  { %v374_v10 = vmul.f32 %v539_v6, %v363_v8  ;;  %v376_v11 = vmul.f32 %v539_v6, %v365_v9  ;;  %v375_v12 = vmul.f32 %v539_v6, %v364_v5  ;;  %v373_v13 = vmul.f32 %v539_v6, %v362_v7 }
 0x3bb   :  { %v384_v14 = vsel %vm366_vm7, %v374_v10, 0.0  ;;  %v398_v15 = vsel %vm366_vm7, %v376_v11, 0.0  ;;  %v391_v16 = vsel %vm366_vm7, %v375_v12, 0.0  ;;  %v377_v17 = vsel %vm366_vm7, %v373_v13, 0.0 }
 0x3bc   :  { %v385_v18 = vrot.slane %v384_v14, 4  ;;  %v399_v19 = vrot.slane %v398_v15, 4  ;;  %v392_v20 = vrot.slane %v391_v16, 4  ;;  %v378_v21 = vrot.slane %v377_v17, 4 }
 0x3be   :  { %v386_v22 = vadd.f32 %v385_v18, %v384_v14  ;;  %v400_v23 = vadd.f32 %v399_v19, %v398_v15  ;;  %v393_v24 = vadd.f32 %v392_v20, %v391_v16  ;;  %v379_v25 = vadd.f32 %v378_v21, %v377_v17 }
 0x3c0   :  { %v387_v26 = vrot.slane %v386_v22, 2  ;;  %v401_v27 = vrot.slane %v400_v23, 2  ;;  %v394_v28 = vrot.slane %v393_v24, 2  ;;  %v380_v29 = vrot.slane %v379_v25, 2 }
 0x3c2   :  { %v388_v30 = vadd.f32 %v387_v26, %v386_v22  ;;  %v402_v31 = vadd.f32 %v401_v27, %v400_v23  ;;  %v395_v32 = vadd.f32 %v394_v28, %v393_v24  ;;  %v381_v33 = vadd.f32 %v380_v29, %v379_v25 }
 0x3c4   :  { %v389_v34 = vrot.slane %v388_v30, 1  ;;  %v403_v35 = vrot.slane %v402_v31, 1  ;;  %v396_v36 = vrot.slane %v395_v32, 1  ;;  %v382_v37 = vrot.slane %v381_v33, 1 }
 0x3c6   :  { %v390_v38 = vadd.f32 %v389_v34, %v388_v30  ;;  %v404_v39 = vadd.f32 %v403_v35, %v402_v31  ;;  %v397_v40 = vadd.f32 %v396_v36, %v395_v32  ;;  %v383_v41 = vadd.f32 %v382_v37, %v381_v33 }
 0x3c8   :  { %v406_v42 = vadd.f32 1e-07, %v390_v38  ;;  %v408_v43 = vadd.f32 1e-07, %v404_v39  ;;  %v407_v44 = vadd.f32 1e-07, %v397_v40 }
 0x3c9   :  { %v405_v45 = vadd.f32 1e-07, %v383_v41 }
 0x3ca   :  { %540 = vrcp.f32 %v406_v42 }
 0x3cb   :  { %542 = vrcp.f32 %v408_v43 }
 0x3cc   :  { %544 = vrcp.f32 %v407_v44 }
 0x3cd   :  { %546 = vrcp.f32 %v405_v45 }
 0x3d7   :  { %v541_v46 = vpop.eup %540 }
 0x3d8   :  { %v543_v47 = vpop.eup %542  ;;  %v414_v48 = vmul.f32 %v541_v46, %v374_v10 }
 0x3d9   :  { %v545_v49 = vpop.eup %544  ;;  %v416_v50 = vmul.f32 %v543_v47, %v376_v11 }
 0x3da   :  { %v547_v51 = vpop.eup %546  ;;  %418 = vst.msk [vmem:[#allocation2 + $0x4] sm:$0xf] %vm366_vm7, %v414_v48  ;;  %v415_v52 = vmul.f32 %v545_v49, %v375_v12 }
 0x3db   :  { %420 = vst.msk [vmem:[#allocation2 + $0xc] sm:$0xf] %vm366_vm7, %v416_v50  ;;  %v413_v53 = vmul.f32 %v547_v51, %v373_v13 }
 0x3dc   :  { %419 = vst.msk [vmem:[#allocation2 + $0x8] sm:$0xf] %vm366_vm7, %v415_v52 }
 0x3dd   :  { %417 = vst.msk [vmem:[#allocation2] sm:$0xf] %vm366_vm7, %v413_v53 }
 0x3de   :  { %559 = shalt.err (!%p556_p4)
}
 0x3df   :  { %s575_s6 = smov 64   ;;  %s576_s7 = smov 4  }
 0x3e0   :  { %432 = dma.vmem_to_hbm [thread:$0]  %s427_s4, 256, %s711_s5, [#allocation3], %s575_s6, %s575_s6, %s576_s7  }
 0x3e1   :  { %568 = dma.done.wait [#allocation3], 256  }
 0x3e2   :  { %569 = vsyncadd [#allocation3], 4294967040 }
 0x3e3   :  { %436 = vsyncpa [#allocation3], 1 }

</bundles_post_ra>
